<compile_context>
chip_gen: v7x
topology: tpu7x:2x2x1
jax: 0.10.0
libtpu: 0.0.40
codegen_flags: <defaults>
</compile_context>

<pallas_src>
import functools

import jax
import jax.numpy as jnp
from jax.experimental import pallas as pl
from jax.experimental.pallas import tpu as pltpu


def _disc_kernel(x_ref, w_ref, o_ref, *, C, KH, KW, Ho):
    """Valid KHxKW conv (Cout=1, no bias) + sigmoid over a block of packed images.

    x_ref: (B_blk, C, H, LW) f32 VMEM -- L images packed side-by-side on lanes
    w_ref: (C*KH*KW,)        f32 SMEM -- flattened weight taps (scalar reads)
    o_ref: (B_blk, Ho, LW)   f32 VMEM -- per image slot, columns [0:Wo] valid
    """
    B = x_ref.shape[0]
    LW = x_ref.shape[-1]

    # Hoist all tap reads: one flat SMEM scalar-read pass before the hot loop.
    taps = [w_ref[i] for i in range(C * KH * KW)]

    def one_group(g, carry):
        # KW per-lane-offset accumulators, (Ho, LW) each -> vreg-resident.
        accs = [jnp.zeros((Ho, LW), jnp.float32) for _ in range(KW)]
        for c in range(C):
            for kh in range(KH):
                xr = x_ref[g, c, kh:kh + Ho, :]          # (Ho, LW) sublane-offset load
                base = c * KH * KW + kh * KW
                for kw in range(KW):
                    accs[kw] = accs[kw] + taps[base + kw] * xr   # lane-dense VPU FMA

        # Combine: res[:, j] = sum_kw accs[kw][:, j + kw].
        # roll by (LW - kw) == jnp.roll(..., -kw): pulls column j+kw into j.
        # The wrap-around only lands in columns >= Wo of the last packed image,
        # which the wrapper discards.  Rotations use the XLU slot.
        res = accs[0]
        for kw in range(1, KW):
            res = res + pltpu.roll(accs[kw], shift=LW - kw, axis=1)

        # sigmoid(x) = 0.5 * (tanh(x/2) + 1): EUP transcendental, no divide.
        res = 0.5 * (jnp.tanh(0.5 * res) + 1.0)
        o_ref[g] = res
        return carry

    jax.lax.fori_loop(0, B, one_group, 0, unroll=True)


def discriminator_forward(image_nchw, weight_oihw):
    """image_nchw: (N, 3, H, W); weight_oihw: (1, 3, 4, 4).

    Returns (N, 1, H-3, W-3) f32 == sigmoid(conv2d_valid(image, weight)).
    """
    N, C, H, W = image_nchw.shape
    _, _, KH, KW = weight_oihw.shape
    Ho, Wo = H - KH + 1, W - KW + 1

    # Lane packing: L images share the 128-lane axis.
    L = max(1, 128 // W)
    LW = L * W

    # Batch blocking: B_blk packed groups per grid step so each step moves
    # ~O(100s of KiB) (per group ~ (C*H + Ho)*LW*4 bytes).  Keep >=2 grid steps
    # when possible so ("parallel",) can shard across TensorCores on v7x.
    # VMEM per step (double-buffered in+out) stays well under 1 MiB here.
    G = pl.cdiv(N, L)
    B_blk = min(8, G)
    if G > 1:
        B_blk = min(B_blk, pl.cdiv(G, 2))
    G_pad = pl.cdiv(G, B_blk) * B_blk
    Np = G_pad * L

    # NOTE: input stays f32 to match the PyTorch reference exactly; a bf16
    # activation load (halved input HBM traffic on v6e) is an optional tradeoff.
    x = image_nchw.astype(jnp.float32)
    if Np != N:
        x = jnp.pad(x, ((0, Np - N), (0, 0), (0, 0), (0, 0)))
    # (Np, C, H, W) -> (G_pad, C, H, L*W): image l of group g occupies lanes
    # [l*W, (l+1)*W) of each (c, h) row.
    xp = x.reshape(G_pad, L, C, H, W).transpose(0, 2, 3, 1, 4).reshape(G_pad, C, H, LW)

    w_flat = weight_oihw[0].astype(jnp.float32).reshape(-1)      # (C*KH*KW,) -> SMEM

    kernel = functools.partial(_disc_kernel, C=C, KH=KH, KW=KW, Ho=Ho)

    out = pl.pallas_call(
        kernel,
        out_shape=jax.ShapeDtypeStruct((G_pad, Ho, LW), jnp.float32),
        grid=(G_pad // B_blk,),
        in_specs=[
            pl.BlockSpec((B_blk, C, H, LW), lambda i: (i, 0, 0, 0)),
            pl.BlockSpec(memory_space=pltpu.MemorySpace.SMEM),    # whole weight in SMEM
        ],
        out_specs=pl.BlockSpec((B_blk, Ho, LW), lambda i: (i, 0, 0)),
        compiler_params=pltpu.CompilerParams(
            dimension_semantics=("parallel",)),                   # shard steps across TCs
    )(xp, w_flat)

    # Unpack: (G_pad, Ho, L*W) -> (Np, Ho, W) -> (N, 1, Ho, Wo); drops the
    # per-slot garbage columns [Wo:W] and the zero-padded batch tail.
    out = out.reshape(G_pad, Ho, L, W).transpose(0, 2, 1, 3).reshape(Np, Ho, W)
    return out[:N, None, :, :Wo]


if __name__ == "__main__":
    key = jax.random.PRNGKey(0)
    k_img, k_w = jax.random.split(key)

    # Small shapes consistent with the module: batch=2, C=3, H=W=16.
    image = jax.random.normal(k_img, (2, 3, 16, 16), dtype=jnp.float32)
    # Synthetic weight matching nn.Conv2d(3, 1, 4, bias=False): (1, 3, 4, 4).
    weight = jax.random.normal(k_w, (1, 3, 4, 4), dtype=jnp.float32) * 0.1

    out = discriminator_forward(image, weight)
    out = jax.block_until_ready(out)

    # Pure-JAX reference for correctness.
    ref = jax.nn.sigmoid(
        jax.lax.conv_general_dilated(
            image, weight,
            window_strides=(1, 1), padding="VALID",
            dimension_numbers=("NCHW", "OIHW", "NCHW"),
        )
    )
    assert out.shape == (2, 1, 13, 13), out.shape
    assert jnp.allclose(out, ref, atol=1e-5, rtol=1e-5), (
        "mismatch vs reference, max err "
        f"{float(jnp.max(jnp.abs(out - ref)))}")

    print("KERNEL_OK")
</pallas_src>

<mosaic_0001>
module attributes {stable_mosaic.version = 11 : i64} {
  func.func @_disc_kernel(%arg0: i32, %arg1: memref<1x3x16x128xf32, #tpu.memory_space<vmem>>, %arg2: memref<48xf32, #tpu.memory_space<smem>>, %arg3: memref<1x13x128xf32, #tpu.memory_space<vmem>>) attributes {dimension_semantics = [#tpu.dimension_semantics<parallel>], iteration_bounds = array<i64: 1>, scalar_prefetch = 0 : i64, scratch_operands = 0 : i64, tpu.core_type = #tpu.core_type<tc>, window_params = [{transform_indices = @transform_0, window_bounds = array<i64: 1, 3, 16, 128>}, {transform_indices = @transform_1, window_bounds = array<i64: 48>}, {transform_indices = @transform_2, window_bounds = array<i64: 1, 13, 128>}]} {
    %c0 = arith.constant 0 : index
    %0 = memref.load %arg2[%c0] : memref<48xf32, #tpu.memory_space<smem>>
    %c1 = arith.constant 1 : index
    %1 = memref.load %arg2[%c1] : memref<48xf32, #tpu.memory_space<smem>>
    %c2 = arith.constant 2 : index
    %2 = memref.load %arg2[%c2] : memref<48xf32, #tpu.memory_space<smem>>
    %c3 = arith.constant 3 : index
    %3 = memref.load %arg2[%c3] : memref<48xf32, #tpu.memory_space<smem>>
    %c4 = arith.constant 4 : index
    %4 = memref.load %arg2[%c4] : memref<48xf32, #tpu.memory_space<smem>>
    %c5 = arith.constant 5 : index
    %5 = memref.load %arg2[%c5] : memref<48xf32, #tpu.memory_space<smem>>
    %c6 = arith.constant 6 : index
    %6 = memref.load %arg2[%c6] : memref<48xf32, #tpu.memory_space<smem>>
    %c7 = arith.constant 7 : index
    %7 = memref.load %arg2[%c7] : memref<48xf32, #tpu.memory_space<smem>>
    %c8 = arith.constant 8 : index
    %8 = memref.load %arg2[%c8] : memref<48xf32, #tpu.memory_space<smem>>
    %c9 = arith.constant 9 : index
    %9 = memref.load %arg2[%c9] : memref<48xf32, #tpu.memory_space<smem>>
    %c10 = arith.constant 10 : index
    %10 = memref.load %arg2[%c10] : memref<48xf32, #tpu.memory_space<smem>>
    %c11 = arith.constant 11 : index
    %11 = memref.load %arg2[%c11] : memref<48xf32, #tpu.memory_space<smem>>
    %c12 = arith.constant 12 : index
    %12 = memref.load %arg2[%c12] : memref<48xf32, #tpu.memory_space<smem>>
    %c13 = arith.constant 13 : index
    %13 = memref.load %arg2[%c13] : memref<48xf32, #tpu.memory_space<smem>>
    %c14 = arith.constant 14 : index
    %14 = memref.load %arg2[%c14] : memref<48xf32, #tpu.memory_space<smem>>
    %c15 = arith.constant 15 : index
    %15 = memref.load %arg2[%c15] : memref<48xf32, #tpu.memory_space<smem>>
    %c16 = arith.constant 16 : index
    %16 = memref.load %arg2[%c16] : memref<48xf32, #tpu.memory_space<smem>>
    %c17 = arith.constant 17 : index
    %17 = memref.load %arg2[%c17] : memref<48xf32, #tpu.memory_space<smem>>
    %c18 = arith.constant 18 : index
    %18 = memref.load %arg2[%c18] : memref<48xf32, #tpu.memory_space<smem>>
    %c19 = arith.constant 19 : index
    %19 = memref.load %arg2[%c19] : memref<48xf32, #tpu.memory_space<smem>>
    %c20 = arith.constant 20 : index
    %20 = memref.load %arg2[%c20] : memref<48xf32, #tpu.memory_space<smem>>
    %c21 = arith.constant 21 : index
    %21 = memref.load %arg2[%c21] : memref<48xf32, #tpu.memory_space<smem>>
    %c22 = arith.constant 22 : index
    %22 = memref.load %arg2[%c22] : memref<48xf32, #tpu.memory_space<smem>>
    %c23 = arith.constant 23 : index
    %23 = memref.load %arg2[%c23] : memref<48xf32, #tpu.memory_space<smem>>
    %c24 = arith.constant 24 : index
    %24 = memref.load %arg2[%c24] : memref<48xf32, #tpu.memory_space<smem>>
    %c25 = arith.constant 25 : index
    %25 = memref.load %arg2[%c25] : memref<48xf32, #tpu.memory_space<smem>>
    %c26 = arith.constant 26 : index
    %26 = memref.load %arg2[%c26] : memref<48xf32, #tpu.memory_space<smem>>
    %c27 = arith.constant 27 : index
    %27 = memref.load %arg2[%c27] : memref<48xf32, #tpu.memory_space<smem>>
    %c28 = arith.constant 28 : index
    %28 = memref.load %arg2[%c28] : memref<48xf32, #tpu.memory_space<smem>>
    %c29 = arith.constant 29 : index
    %29 = memref.load %arg2[%c29] : memref<48xf32, #tpu.memory_space<smem>>
    %c30 = arith.constant 30 : index
    %30 = memref.load %arg2[%c30] : memref<48xf32, #tpu.memory_space<smem>>
    %c31 = arith.constant 31 : index
    %31 = memref.load %arg2[%c31] : memref<48xf32, #tpu.memory_space<smem>>
    %c32 = arith.constant 32 : index
    %32 = memref.load %arg2[%c32] : memref<48xf32, #tpu.memory_space<smem>>
    %c33 = arith.constant 33 : index
    %33 = memref.load %arg2[%c33] : memref<48xf32, #tpu.memory_space<smem>>
    %c34 = arith.constant 34 : index
    %34 = memref.load %arg2[%c34] : memref<48xf32, #tpu.memory_space<smem>>
    %c35 = arith.constant 35 : index
    %35 = memref.load %arg2[%c35] : memref<48xf32, #tpu.memory_space<smem>>
    %c36 = arith.constant 36 : index
    %36 = memref.load %arg2[%c36] : memref<48xf32, #tpu.memory_space<smem>>
    %c37 = arith.constant 37 : index
    %37 = memref.load %arg2[%c37] : memref<48xf32, #tpu.memory_space<smem>>
    %c38 = arith.constant 38 : index
    %38 = memref.load %arg2[%c38] : memref<48xf32, #tpu.memory_space<smem>>
    %c39 = arith.constant 39 : index
    %39 = memref.load %arg2[%c39] : memref<48xf32, #tpu.memory_space<smem>>
    %c40 = arith.constant 40 : index
    %40 = memref.load %arg2[%c40] : memref<48xf32, #tpu.memory_space<smem>>
    %c41 = arith.constant 41 : index
    %41 = memref.load %arg2[%c41] : memref<48xf32, #tpu.memory_space<smem>>
    %c42 = arith.constant 42 : index
    %42 = memref.load %arg2[%c42] : memref<48xf32, #tpu.memory_space<smem>>
    %c43 = arith.constant 43 : index
    %43 = memref.load %arg2[%c43] : memref<48xf32, #tpu.memory_space<smem>>
    %c44 = arith.constant 44 : index
    %44 = memref.load %arg2[%c44] : memref<48xf32, #tpu.memory_space<smem>>
    %c45 = arith.constant 45 : index
    %45 = memref.load %arg2[%c45] : memref<48xf32, #tpu.memory_space<smem>>
    %c46 = arith.constant 46 : index
    %46 = memref.load %arg2[%c46] : memref<48xf32, #tpu.memory_space<smem>>
    %c47 = arith.constant 47 : index
    %47 = memref.load %arg2[%c47] : memref<48xf32, #tpu.memory_space<smem>>
    %c0_i32 = arith.constant 0 : i32
    %cst = arith.constant 0.000000e+00 : f32
    %48 = vector.broadcast %cst : f32 to vector<13x128xf32>
    %cst_0 = arith.constant 0.000000e+00 : f32
    %49 = vector.broadcast %cst_0 : f32 to vector<13x128xf32>
    %cst_1 = arith.constant 0.000000e+00 : f32
    %50 = vector.broadcast %cst_1 : f32 to vector<13x128xf32>
    %cst_2 = arith.constant 0.000000e+00 : f32
    %51 = vector.broadcast %cst_2 : f32 to vector<13x128xf32>
    %52 = arith.index_cast %c0_i32 : i32 to index
    %c0_3 = arith.constant 0 : index
    %c0_4 = arith.constant 0 : index
    %c0_5 = arith.constant 0 : index
    %53 = vector.load %arg1[%52, %c0_3, %c0_4, %c0_5] : memref<1x3x16x128xf32, #tpu.memory_space<vmem>>, vector<1x1x13x128xf32>
    %54 = vector.shape_cast %53 : vector<1x1x13x128xf32> to vector<13x128xf32>
    %55 = vector.broadcast %0 : f32 to vector<13x128xf32>
    %56 = arith.mulf %55, %54 : vector<13x128xf32>
    %57 = arith.addf %48, %56 : vector<13x128xf32>
    %58 = vector.broadcast %1 : f32 to vector<13x128xf32>
    %59 = arith.mulf %58, %54 : vector<13x128xf32>
    %60 = arith.addf %49, %59 : vector<13x128xf32>
    %61 = vector.broadcast %2 : f32 to vector<13x128xf32>
    %62 = arith.mulf %61, %54 : vector<13x128xf32>
    %63 = arith.addf %50, %62 : vector<13x128xf32>
    %64 = vector.broadcast %3 : f32 to vector<13x128xf32>
    %65 = arith.mulf %64, %54 : vector<13x128xf32>
    %66 = arith.addf %51, %65 : vector<13x128xf32>
    %67 = arith.index_cast %c0_i32 : i32 to index
    %c0_6 = arith.constant 0 : index
    %c1_7 = arith.constant 1 : index
    %c0_8 = arith.constant 0 : index
    %68 = vector.load %arg1[%67, %c0_6, %c1_7, %c0_8] : memref<1x3x16x128xf32, #tpu.memory_space<vmem>>, vector<1x1x13x128xf32>
    %69 = vector.shape_cast %68 : vector<1x1x13x128xf32> to vector<13x128xf32>
    %70 = vector.broadcast %4 : f32 to vector<13x128xf32>
    %71 = arith.mulf %70, %69 : vector<13x128xf32>
    %72 = arith.addf %57, %71 : vector<13x128xf32>
    %73 = vector.broadcast %5 : f32 to vector<13x128xf32>
    %74 = arith.mulf %73, %69 : vector<13x128xf32>
    %75 = arith.addf %60, %74 : vector<13x128xf32>
    %76 = vector.broadcast %6 : f32 to vector<13x128xf32>
    %77 = arith.mulf %76, %69 : vector<13x128xf32>
    %78 = arith.addf %63, %77 : vector<13x128xf32>
    %79 = vector.broadcast %7 : f32 to vector<13x128xf32>
    %80 = arith.mulf %79, %69 : vector<13x128xf32>
    %81 = arith.addf %66, %80 : vector<13x128xf32>
    %82 = arith.index_cast %c0_i32 : i32 to index
    %c0_9 = arith.constant 0 : index
    %c2_10 = arith.constant 2 : index
    %c0_11 = arith.constant 0 : index
    %83 = vector.load %arg1[%82, %c0_9, %c2_10, %c0_11] : memref<1x3x16x128xf32, #tpu.memory_space<vmem>>, vector<1x1x13x128xf32>
    %84 = vector.shape_cast %83 : vector<1x1x13x128xf32> to vector<13x128xf32>
    %85 = vector.broadcast %8 : f32 to vector<13x128xf32>
    %86 = arith.mulf %85, %84 : vector<13x128xf32>
    %87 = arith.addf %72, %86 : vector<13x128xf32>
    %88 = vector.broadcast %9 : f32 to vector<13x128xf32>
    %89 = arith.mulf %88, %84 : vector<13x128xf32>
    %90 = arith.addf %75, %89 : vector<13x128xf32>
    %91 = vector.broadcast %10 : f32 to vector<13x128xf32>
    %92 = arith.mulf %91, %84 : vector<13x128xf32>
    %93 = arith.addf %78, %92 : vector<13x128xf32>
    %94 = vector.broadcast %11 : f32 to vector<13x128xf32>
    %95 = arith.mulf %94, %84 : vector<13x128xf32>
    %96 = arith.addf %81, %95 : vector<13x128xf32>
    %97 = arith.index_cast %c0_i32 : i32 to index
    %c0_12 = arith.constant 0 : index
    %c3_13 = arith.constant 3 : index
    %c0_14 = arith.constant 0 : index
    %98 = vector.load %arg1[%97, %c0_12, %c3_13, %c0_14] : memref<1x3x16x128xf32, #tpu.memory_space<vmem>>, vector<1x1x13x128xf32>
    %99 = vector.shape_cast %98 : vector<1x1x13x128xf32> to vector<13x128xf32>
    %100 = vector.broadcast %12 : f32 to vector<13x128xf32>
    %101 = arith.mulf %100, %99 : vector<13x128xf32>
    %102 = arith.addf %87, %101 : vector<13x128xf32>
    %103 = vector.broadcast %13 : f32 to vector<13x128xf32>
    %104 = arith.mulf %103, %99 : vector<13x128xf32>
    %105 = arith.addf %90, %104 : vector<13x128xf32>
    %106 = vector.broadcast %14 : f32 to vector<13x128xf32>
    %107 = arith.mulf %106, %99 : vector<13x128xf32>
    %108 = arith.addf %93, %107 : vector<13x128xf32>
    %109 = vector.broadcast %15 : f32 to vector<13x128xf32>
    %110 = arith.mulf %109, %99 : vector<13x128xf32>
    %111 = arith.addf %96, %110 : vector<13x128xf32>
    %112 = arith.index_cast %c0_i32 : i32 to index
    %c1_15 = arith.constant 1 : index
    %c0_16 = arith.constant 0 : index
    %c0_17 = arith.constant 0 : index
    %113 = vector.load %arg1[%112, %c1_15, %c0_16, %c0_17] : memref<1x3x16x128xf32, #tpu.memory_space<vmem>>, vector<1x1x13x128xf32>
    %114 = vector.shape_cast %113 : vector<1x1x13x128xf32> to vector<13x128xf32>
    %115 = vector.broadcast %16 : f32 to vector<13x128xf32>
    %116 = arith.mulf %115, %114 : vector<13x128xf32>
    %117 = arith.addf %102, %116 : vector<13x128xf32>
    %118 = vector.broadcast %17 : f32 to vector<13x128xf32>
    %119 = arith.mulf %118, %114 : vector<13x128xf32>
    %120 = arith.addf %105, %119 : vector<13x128xf32>
    %121 = vector.broadcast %18 : f32 to vector<13x128xf32>
    %122 = arith.mulf %121, %114 : vector<13x128xf32>
    %123 = arith.addf %108, %122 : vector<13x128xf32>
    %124 = vector.broadcast %19 : f32 to vector<13x128xf32>
    %125 = arith.mulf %124, %114 : vector<13x128xf32>
    %126 = arith.addf %111, %125 : vector<13x128xf32>
    %127 = arith.index_cast %c0_i32 : i32 to index
    %c1_18 = arith.constant 1 : index
    %c1_19 = arith.constant 1 : index
    %c0_20 = arith.constant 0 : index
    %128 = vector.load %arg1[%127, %c1_18, %c1_19, %c0_20] : memref<1x3x16x128xf32, #tpu.memory_space<vmem>>, vector<1x1x13x128xf32>
    %129 = vector.shape_cast %128 : vector<1x1x13x128xf32> to vector<13x128xf32>
    %130 = vector.broadcast %20 : f32 to vector<13x128xf32>
    %131 = arith.mulf %130, %129 : vector<13x128xf32>
    %132 = arith.addf %117, %131 : vector<13x128xf32>
    %133 = vector.broadcast %21 : f32 to vector<13x128xf32>
    %134 = arith.mulf %133, %129 : vector<13x128xf32>
    %135 = arith.addf %120, %134 : vector<13x128xf32>
    %136 = vector.broadcast %22 : f32 to vector<13x128xf32>
    %137 = arith.mulf %136, %129 : vector<13x128xf32>
    %138 = arith.addf %123, %137 : vector<13x128xf32>
    %139 = vector.broadcast %23 : f32 to vector<13x128xf32>
    %140 = arith.mulf %139, %129 : vector<13x128xf32>
    %141 = arith.addf %126, %140 : vector<13x128xf32>
    %142 = arith.index_cast %c0_i32 : i32 to index
    %c1_21 = arith.constant 1 : index
    %c2_22 = arith.constant 2 : index
    %c0_23 = arith.constant 0 : index
    %143 = vector.load %arg1[%142, %c1_21, %c2_22, %c0_23] : memref<1x3x16x128xf32, #tpu.memory_space<vmem>>, vector<1x1x13x128xf32>
    %144 = vector.shape_cast %143 : vector<1x1x13x128xf32> to vector<13x128xf32>
    %145 = vector.broadcast %24 : f32 to vector<13x128xf32>
    %146 = arith.mulf %145, %144 : vector<13x128xf32>
    %147 = arith.addf %132, %146 : vector<13x128xf32>
    %148 = vector.broadcast %25 : f32 to vector<13x128xf32>
    %149 = arith.mulf %148, %144 : vector<13x128xf32>
    %150 = arith.addf %135, %149 : vector<13x128xf32>
    %151 = vector.broadcast %26 : f32 to vector<13x128xf32>
    %152 = arith.mulf %151, %144 : vector<13x128xf32>
    %153 = arith.addf %138, %152 : vector<13x128xf32>
    %154 = vector.broadcast %27 : f32 to vector<13x128xf32>
    %155 = arith.mulf %154, %144 : vector<13x128xf32>
    %156 = arith.addf %141, %155 : vector<13x128xf32>
    %157 = arith.index_cast %c0_i32 : i32 to index
    %c1_24 = arith.constant 1 : index
    %c3_25 = arith.constant 3 : index
    %c0_26 = arith.constant 0 : index
    %158 = vector.load %arg1[%157, %c1_24, %c3_25, %c0_26] : memref<1x3x16x128xf32, #tpu.memory_space<vmem>>, vector<1x1x13x128xf32>
    %159 = vector.shape_cast %158 : vector<1x1x13x128xf32> to vector<13x128xf32>
    %160 = vector.broadcast %28 : f32 to vector<13x128xf32>
    %161 = arith.mulf %160, %159 : vector<13x128xf32>
    %162 = arith.addf %147, %161 : vector<13x128xf32>
    %163 = vector.broadcast %29 : f32 to vector<13x128xf32>
    %164 = arith.mulf %163, %159 : vector<13x128xf32>
    %165 = arith.addf %150, %164 : vector<13x128xf32>
    %166 = vector.broadcast %30 : f32 to vector<13x128xf32>
    %167 = arith.mulf %166, %159 : vector<13x128xf32>
    %168 = arith.addf %153, %167 : vector<13x128xf32>
    %169 = vector.broadcast %31 : f32 to vector<13x128xf32>
    %170 = arith.mulf %169, %159 : vector<13x128xf32>
    %171 = arith.addf %156, %170 : vector<13x128xf32>
    %172 = arith.index_cast %c0_i32 : i32 to index
    %c2_27 = arith.constant 2 : index
    %c0_28 = arith.constant 0 : index
    %c0_29 = arith.constant 0 : index
    %173 = vector.load %arg1[%172, %c2_27, %c0_28, %c0_29] : memref<1x3x16x128xf32, #tpu.memory_space<vmem>>, vector<1x1x13x128xf32>
    %174 = vector.shape_cast %173 : vector<1x1x13x128xf32> to vector<13x128xf32>
    %175 = vector.broadcast %32 : f32 to vector<13x128xf32>
    %176 = arith.mulf %175, %174 : vector<13x128xf32>
    %177 = arith.addf %162, %176 : vector<13x128xf32>
    %178 = vector.broadcast %33 : f32 to vector<13x128xf32>
    %179 = arith.mulf %178, %174 : vector<13x128xf32>
    %180 = arith.addf %165, %179 : vector<13x128xf32>
    %181 = vector.broadcast %34 : f32 to vector<13x128xf32>
    %182 = arith.mulf %181, %174 : vector<13x128xf32>
    %183 = arith.addf %168, %182 : vector<13x128xf32>
    %184 = vector.broadcast %35 : f32 to vector<13x128xf32>
    %185 = arith.mulf %184, %174 : vector<13x128xf32>
    %186 = arith.addf %171, %185 : vector<13x128xf32>
    %187 = arith.index_cast %c0_i32 : i32 to index
    %c2_30 = arith.constant 2 : index
    %c1_31 = arith.constant 1 : index
    %c0_32 = arith.constant 0 : index
    %188 = vector.load %arg1[%187, %c2_30, %c1_31, %c0_32] : memref<1x3x16x128xf32, #tpu.memory_space<vmem>>, vector<1x1x13x128xf32>
    %189 = vector.shape_cast %188 : vector<1x1x13x128xf32> to vector<13x128xf32>
    %190 = vector.broadcast %36 : f32 to vector<13x128xf32>
    %191 = arith.mulf %190, %189 : vector<13x128xf32>
    %192 = arith.addf %177, %191 : vector<13x128xf32>
    %193 = vector.broadcast %37 : f32 to vector<13x128xf32>
    %194 = arith.mulf %193, %189 : vector<13x128xf32>
    %195 = arith.addf %180, %194 : vector<13x128xf32>
    %196 = vector.broadcast %38 : f32 to vector<13x128xf32>
    %197 = arith.mulf %196, %189 : vector<13x128xf32>
    %198 = arith.addf %183, %197 : vector<13x128xf32>
    %199 = vector.broadcast %39 : f32 to vector<13x128xf32>
    %200 = arith.mulf %199, %189 : vector<13x128xf32>
    %201 = arith.addf %186, %200 : vector<13x128xf32>
    %202 = arith.index_cast %c0_i32 : i32 to index
    %c2_33 = arith.constant 2 : index
    %c2_34 = arith.constant 2 : index
    %c0_35 = arith.constant 0 : index
    %203 = vector.load %arg1[%202, %c2_33, %c2_34, %c0_35] : memref<1x3x16x128xf32, #tpu.memory_space<vmem>>, vector<1x1x13x128xf32>
    %204 = vector.shape_cast %203 : vector<1x1x13x128xf32> to vector<13x128xf32>
    %205 = vector.broadcast %40 : f32 to vector<13x128xf32>
    %206 = arith.mulf %205, %204 : vector<13x128xf32>
    %207 = arith.addf %192, %206 : vector<13x128xf32>
    %208 = vector.broadcast %41 : f32 to vector<13x128xf32>
    %209 = arith.mulf %208, %204 : vector<13x128xf32>
    %210 = arith.addf %195, %209 : vector<13x128xf32>
    %211 = vector.broadcast %42 : f32 to vector<13x128xf32>
    %212 = arith.mulf %211, %204 : vector<13x128xf32>
    %213 = arith.addf %198, %212 : vector<13x128xf32>
    %214 = vector.broadcast %43 : f32 to vector<13x128xf32>
    %215 = arith.mulf %214, %204 : vector<13x128xf32>
    %216 = arith.addf %201, %215 : vector<13x128xf32>
    %217 = arith.index_cast %c0_i32 : i32 to index
    %c2_36 = arith.constant 2 : index
    %c3_37 = arith.constant 3 : index
    %c0_38 = arith.constant 0 : index
    %218 = vector.load %arg1[%217, %c2_36, %c3_37, %c0_38] : memref<1x3x16x128xf32, #tpu.memory_space<vmem>>, vector<1x1x13x128xf32>
    %219 = vector.shape_cast %218 : vector<1x1x13x128xf32> to vector<13x128xf32>
    %220 = vector.broadcast %44 : f32 to vector<13x128xf32>
    %221 = arith.mulf %220, %219 : vector<13x128xf32>
    %222 = arith.addf %207, %221 : vector<13x128xf32>
    %223 = vector.broadcast %45 : f32 to vector<13x128xf32>
    %224 = arith.mulf %223, %219 : vector<13x128xf32>
    %225 = arith.addf %210, %224 : vector<13x128xf32>
    %226 = vector.broadcast %46 : f32 to vector<13x128xf32>
    %227 = arith.mulf %226, %219 : vector<13x128xf32>
    %228 = arith.addf %213, %227 : vector<13x128xf32>
    %229 = vector.broadcast %47 : f32 to vector<13x128xf32>
    %230 = arith.mulf %229, %219 : vector<13x128xf32>
    %231 = arith.addf %216, %230 : vector<13x128xf32>
    %c127_i32 = arith.constant 127 : i32
    %232 = tpu.dynamic_rotate %225 by %c127_i32 dim 1 : vector<13x128xf32>, i32 -> vector<13x128xf32>
    %233 = arith.addf %222, %232 : vector<13x128xf32>
    %c126_i32 = arith.constant 126 : i32
    %234 = tpu.dynamic_rotate %228 by %c126_i32 dim 1 : vector<13x128xf32>, i32 -> vector<13x128xf32>
    %235 = arith.addf %233, %234 : vector<13x128xf32>
    %c125_i32 = arith.constant 125 : i32
    %236 = tpu.dynamic_rotate %231 by %c125_i32 dim 1 : vector<13x128xf32>, i32 -> vector<13x128xf32>
    %237 = arith.addf %235, %236 : vector<13x128xf32>
    %cst_39 = arith.constant 5.000000e-01 : f32
    %238 = vector.broadcast %cst_39 : f32 to vector<13x128xf32>
    %239 = arith.mulf %238, %237 : vector<13x128xf32>
    %240 = math.tanh %239 : vector<13x128xf32>
    %cst_40 = arith.constant 1.000000e+00 : f32
    %241 = vector.broadcast %cst_40 : f32 to vector<13x128xf32>
    %242 = arith.addf %240, %241 : vector<13x128xf32>
    %cst_41 = arith.constant 5.000000e-01 : f32
    %243 = vector.broadcast %cst_41 : f32 to vector<13x128xf32>
    %244 = arith.mulf %243, %242 : vector<13x128xf32>
    %245 = arith.index_cast %c0_i32 : i32 to index
    %c0_42 = arith.constant 0 : index
    %c0_43 = arith.constant 0 : index
    %246 = vector.load %arg3[%245, %c0_42, %c0_43] : memref<1x13x128xf32, #tpu.memory_space<vmem>>, vector<1x13x128xf32>
    %247 = vector.shape_cast %246 : vector<1x13x128xf32> to vector<13x128xf32>
    %248 = vector.shape_cast %244 : vector<13x128xf32> to vector<1x13x128xf32>
    tpu.vector_store %arg3[%245, %c0_42, %c0_43], %248 {strides = array<i32>} : memref<1x13x128xf32, #tpu.memory_space<vmem>>, vector<1x13x128xf32>,
    %c1_i32 = arith.constant 1 : i32
    return
  }
  func.func @transform_0(%arg0: i32) -> (i32, i32, i32, i32) {
    %c0_i32 = arith.constant 0 : i32
    %c0_i32_0 = arith.constant 0 : i32
    %c0_i32_1 = arith.constant 0 : i32
    %c0_i32_2 = arith.constant 0 : i32
    return %arg0, %c0_i32, %c0_i32_0, %c0_i32_1 : i32, i32, i32, i32
  }
  func.func @transform_1(%arg0: i32) -> i32 {
    %c0_i32 = arith.constant 0 : i32
    %c0_i32_0 = arith.constant 0 : i32
    return %c0_i32 : i32
  }
  func.func @transform_2(%arg0: i32) -> (i32, i32, i32) {
    %c0_i32 = arith.constant 0 : i32
    %c0_i32_0 = arith.constant 0 : i32
    %c0_i32_1 = arith.constant 0 : i32
    return %arg0, %c0_i32, %c0_i32_0 : i32, i32, i32
  }
}

</mosaic_0001>

<bundles_post_ra>
// kernel: tpu_custom_call.1
= control target key start
LH: loop header
LB: loop body
LE: loop exit
PB: predicated region body
PF: predicated region fallthrough
CT: control target
= control target key end

     0   :  { %7 = vsyncpa [#allocation3], 0  ;;  %s859_s0 = inlined_call_operand.hbm [shape: f32[1,3,16,128], index: 0, kind: input, shape index: {}]   ;;  %s860_s1 = inlined_call_operand.vmem [shape: f32[48], index: 1, kind: input, shape index: {}]   ;;  %s861_s2 = inlined_call_operand.vmem [shape: f32[1,13,128], index: 2, kind: output, shape index: {}]  }
   0x1   :  { %8 = vsyncpa [#allocation4], 0  ;;  %s482_s9 = smov [#allocation2]   ;;  %s27_s13 = sshll.u32 %s860_s1, 4  ;;  %s28_s13 = int_to_ptr.vmem [resolvable:$true] %s27_s13 }
   0x2   :  { %s14_s10 = sshll.u32 %s482_s9, 4  ;;  %s444_s16 = scalar_lea.hbm %s859_s0, 768  ;;  %s15_s10 = int_to_ptr.vmem [resolvable:$true] %s14_s10 }
   0x3   :  { %p445_p0 = scmp.ne.s32.totalorder %s859_s0, %s444_s16  ;;  %p448_p1 = scmp.lt.u32.totalorder %s444_s16, %s859_s0 }
   0x5   :  { %p450_p2 = pnand %p448_p1, %p445_p0 }
   0x7   :  { %453 = shalt.err (!%p450_p2)
}
   0x8   :  { %s454_s21 = scalar_lea.vmem %s15_s10, 768  ;;  %p459_p4 = scmp.lt.s32.totalorder %s15_s10, %s15_s10 }
   0x9   :  { %p455_p3 = scmp.ne.s32.totalorder %s15_s10, %s454_s21  ;;  %p460_p5 = scmp.lt.s32.totalorder %s454_s21, %s454_s21 }
   0xb   :  { %p461_p6 = por %p460_p5, %p459_p4 }
   0xd   :  { %p462_p7 = pnand %p461_p6, %p455_p3 }
   0xf   :  { %465 = shalt.err (!%p462_p7)
}
  0x10   :  { %s483_s1 = smov 128   ;;  %s484_s22 = smov 8  }
  0x11   :  { %20 = dma.hbm_to_vmem [thread:$0]  %s859_s0, 768, %s15_s10, [#allocation3], %s483_s1, %s483_s1, %s484_s22  }
  0x12   :  { %s466_s25 = scalar_lea.vmem %s28_s13, 16  ;;  %p471_p9 = scmp.lt.s32.totalorder %s28_s13, %s28_s13 }
  0x13   :  { %p467_p8 = scmp.ne.s32.totalorder %s28_s13, %s466_s25  ;;  %p472_p10 = scmp.lt.s32.totalorder %s466_s25, %s466_s25 }
  0x15   :  { %p473_p11 = por %p472_p10, %p471_p9 }
  0x17   :  { %p474_p12 = pnand %p473_p11, %p467_p8 }
  0x19   :  { %477 = shalt.err (!%p474_p12)
}
  0x1a   :  { %s485_s26 = smov [#allocation5]  }
  0x1b   :  { %30 = dma.vmem_to_smem %s28_s13, 16, %s485_s26, [#allocation4]  }
  0x1c   :  { %478 = dma.done.wait [#allocation3], 768  }
  0x1d   :  { %479 = vsyncadd [#allocation3], 4294966528 }
  0x1e   :  { %480 = dma.done.wait [#allocation4], 16  }
  0x1f   :  { %481 = vsyncadd [#allocation4], 4294967280 }
  0x20   :  { %37 = sfence }
  0x21   :  { %s519_s27 = sld [smem:[#allocation5 + $0x2]]  ;;  %s521_s28 = sld [smem:[#allocation5 + $0x6]]  ;;  %v535_v0 = vld [vmem:[#allocation2] sm:$0xff]  ;;  %v549_v6 = vld [vmem:[#allocation2 + $0x8] sm:$0x1f]  ;;  %v561_v13 = vld [vmem:[#allocation2 + $0x10] sm:$0xff] }
  0x22   :  { %s523_s0 = sld [smem:[#allocation5 + $0xa]]  ;;  %s525_s29 = sld [smem:[#allocation5 + $0xe]]  ;;  %v537_v1 = vld [vmem:[#allocation2 + $0x1] sm:$0xff]  ;;  %v552_v8 = vld [vmem:[#allocation2 + $0x9] sm:$0x1f]  ;;  %v574_v20 = vld [vmem:[#allocation2 + $0x11] sm:$0xff] }
  0x23   :  { %s527_s30 = sld [smem:[#allocation5 + $0x12]]  ;;  %s529_s3 = sld [smem:[#allocation5 + $0x16]]  ;;  %v543_v4 = vld [vmem:[#allocation2 + $0x2] sm:$0xff]  ;;  %v557_v10 = vld [vmem:[#allocation2 + $0xa] sm:$0x1f]  ;;  %v579_v23 = vld [vmem:[#allocation2 + $0x12] sm:$0xff] }
  0x24   :  { %s531_s4 = sld [smem:[#allocation5 + $0x1a]]  ;;  %s533_s5 = sld [smem:[#allocation5 + $0x1e]]  ;;  %v545_v5 = vld [vmem:[#allocation2 + $0x3] sm:$0xff]  ;;  %v569_v17 = vld [vmem:[#allocation2 + $0xb] sm:$0x1f]  ;;  %v597_v30 = vld [vmem:[#allocation2 + $0x13] sm:$0xff] }
  0x25   :  { %s539_s6 = sld [smem:[#allocation5 + $0x22]]  ;;  %s547_s7 = sld [smem:[#allocation5 + $0x26]]  ;;  %v572_v19 = vld [vmem:[#allocation2 + $0x18] sm:$0x1f]  ;;  %v620_v40 = vld [vmem:[#allocation2 + $0x20] sm:$0xff] }
  0x26   :  { %s555_s8 = sld [smem:[#allocation5 + $0x2a]]  ;;  %s564_s9 = sld [smem:[#allocation5 + $0x1]]  ;;  %v576_v21 = vld [vmem:[#allocation2 + $0x19] sm:$0x1f]  ;;  %864 = vst [vmem:[#allocation8_spill] sm:$0xff] %v620_v40  ;;  %v643_v53 = vld [vmem:[#allocation2 + $0x21] sm:$0xff] }
  0x27   :  { %v98_v2 = vstv %s519_s27  ;;  %v120_v3 = vstv %s521_s28  ;;  %s566_s10 = sld [smem:[#allocation5 + $0x2e]]  ;;  %s581_s11 = sld [smem:[#allocation5 + $0x5]]  ;;  %v584_v26 = vld [vmem:[#allocation2 + $0x1a] sm:$0x1f]  ;;  %v632_v46 = vld [vmem:[#allocation2 + $0x28] sm:$0x1f] }
  0x28   :  { %v99_v7 = vmul.f32 %v98_v2, %v535_v0  ;;  %v121_v9 = vmul.f32 %v120_v3, %v537_v1  ;;  %v142_v11 = vstv %s523_s0  ;;  %v164_v12 = vstv %s525_s29  ;;  %s587_s12 = sld [smem:[#allocation5 + $0x9]]  ;;  %s589_s13 = sld [smem:[#allocation5 + $0xd]]  ;;  %v599_v31 = vld [vmem:[#allocation2 + $0x1b] sm:$0x1f]  ;;  %v645_v54 = vld [vmem:[#allocation2 + $0x29] sm:$0x1f] }
  0x29   :  { %v187_v14 = vstv %s527_s30  ;;  %v143_v16 = vmul.f32 %v142_v11, %v543_v4  ;;  %v165_v18 = vmul.f32 %v164_v12, %v545_v5  ;;  %v209_v22 = vstv %s529_s3  ;;  %s602_s14 = sld [smem:[#allocation5 + $0x11]]  ;;  %s611_s15 = sld [smem:[#allocation5 + $0x15]]  ;;  %v647_v55 = vld [vmem:[#allocation2 + $0x22] sm:$0xff]  ;;  %v659_v63 = vld [vmem:[#allocation2 + $0x2a] sm:$0x1f] }
  0x2a   :  { %v123_v15 = vadd.f32 %v121_v9, %v99_v7  ;;  %v188_v25 = vmul.f32 %v187_v14, %v561_v13  ;;  %v231_v27 = vstv %s531_s4  ;;  %v592_v28 = vmul.f32 %v98_v2, %v549_v6  ;;  %s623_s16 = sld [smem:[#allocation5 + $0x19]]  ;;  %s634_s17 = sld [smem:[#allocation5 + $0x1d]]  ;;  %v661_v2 = vld [vmem:[#allocation2 + $0x23] sm:$0xff] }
  0x2b   :  { %v595_v29 = vmul.f32 %v120_v3, %v552_v8  ;;  %v253_v32 = vstv %s533_s5  ;;  %v605_v33 = vmul.f32 %v142_v11, %v557_v10  ;;  %v608_v34 = vmul.f32 %v164_v12, %v569_v17  ;;  %s636_s18 = sld [smem:[#allocation5 + $0x21]]  ;;  %s649_s19 = sld [smem:[#allocation5 + $0x25]] }
  0x2c   :  { %v145_v24 = vadd.f32 %v143_v16, %v123_v15  ;;  %v210_v36 = vmul.f32 %v209_v22, %v574_v20  ;;  %v614_v37 = vmul.f32 %v187_v14, %v572_v19  ;;  %v617_v38 = vmul.f32 %v209_v22, %v576_v21  ;;  %s664_s20 = sld [smem:[#allocation5 + $0x29]]  ;;  %s672_s21 = sld [smem:[#allocation5 + $0x2d]] }
  0x2d   :  { %v232_v39 = vmul.f32 %v231_v27, %v579_v23  ;;  %v276_v41 = vstv %s539_s6  ;;  %v626_v43 = vmul.f32 %v231_v27, %v584_v26  ;;  %v254_v44 = vmul.f32 %v253_v32, %v597_v30  ;;  %s675_s1 = sld [smem:[#allocation5 + $0x3]]  ;;  %s681_s22 = sld [smem:[#allocation5 + $0x7]] }
  0x2e   :  { %v167_v35 = vadd.f32 %v165_v18, %v145_v24  ;;  %v630_v45 = vmul.f32 %v253_v32, %v599_v31  ;;  %v298_v47 = vstv %s547_s7  ;;  %v320_v48 = vstv %s555_s8  ;;  %v677_v18 = vld [vmem:[#allocation2 + $0x2b] sm:$0x1f]  ;;  %s689_s23 = sld [smem:[#allocation5 + $0xb]]  ;;  %s691_s24 = sld [smem:[#allocation5 + $0xf]] }
  0x2f   :  { %v93_v49 = vstv %s564_s9  ;;  %v115_v50 = vstv %s581_s11  ;;  %v277_v52 = vmul.f32 %v276_v41, %v620_v40  ;;  %v654_v58 = vmul.f32 %v276_v41, %v632_v46  ;;  %s701_s25 = sld [smem:[#allocation5 + $0x13]]  ;;  %s709_s26 = sld [smem:[#allocation5 + $0x17]] }
  0x30   :  { %v190_v42 = vadd.f32 %v188_v25, %v167_v35  ;;  %v94_v56 = vmul.f32 %v93_v49, %v535_v0  ;;  %v116_v57 = vmul.f32 %v115_v50, %v537_v1  ;;  %v137_v59 = vstv %s587_s12  ;;  %s716_s27 = sld [smem:[#allocation5 + $0x1b]]  ;;  %s721_s28 = sld [smem:[#allocation5 + $0x1f]] }
  0x31   :  { %v159_v60 = vstv %s589_s13  ;;  %v182_v61 = vstv %s602_s14  ;;  %v342_v3 = vstv %s566_s10  ;;  %v138_v9 = vmul.f32 %v137_v59, %v543_v4  ;;  %s486_s0 = smov 126   ;;  %s732_s29 = sld [smem:[#allocation5 + $0x23]] }
  0x32   :  { %v212_v51 = vadd.f32 %v210_v36, %v190_v42  ;;  %v118_v7 = vadd.f32 %v116_v57, %v94_v56  ;;  %v299_v11 = vmul.f32 %v298_v47, %v643_v53  ;;  %v669_v12 = vmul.f32 %v298_v47, %v645_v54  ;;  %s741_s30 = sld [smem:[#allocation5 + $0x27]]  ;;  %s748_s3 = sld [smem:[#allocation5 + $0x2b]] }
  0x33   :  { %v321_v14 = vmul.f32 %v320_v48, %v647_v55  ;;  %v160_v15 = vmul.f32 %v159_v60, %v545_v5  ;;  %v183_v24 = vmul.f32 %v182_v61, %v561_v13  ;;  %v204_v25 = vstv %s611_s15  ;;  %s755_s4 = sld [smem:[#allocation5 + $0x2f]]  ;;  %s487_s5 = smov 127  }
  0x34   :  { %v234_v62 = vadd.f32 %v232_v39, %v212_v51  ;;  %v140_v22 = vadd.f32 %v138_v9, %v118_v7  ;;  %v684_v27 = vmul.f32 %v320_v48, %v659_v63  ;;  %v343_v32 = vmul.f32 %v342_v3, %v661_v2  ;;  %s769_s6 = sld [smem:[#allocation5 + $0x4]]  ;;  %s778_s7 = sld [smem:[#allocation5 + $0x8]] }
  0x35   :  { %v205_v35 = vmul.f32 %v204_v25, %v574_v20  ;;  %v226_v36 = vstv %s623_s16  ;;  %v248_v42 = vstv %s634_s17  ;;  %v696_v47 = vmul.f32 %v342_v3, %v677_v18  ;;  %s784_s8 = sld [smem:[#allocation5 + $0xc]]  ;;  %s786_s9 = sld [smem:[#allocation5]] }
  0x36   :  { %v256_v16 = vadd.f32 %v254_v44, %v234_v62  ;;  %v162_v41 = vadd.f32 %v160_v15, %v140_v22  ;;  %v271_v44 = vstv %s636_s18  ;;  %v95_v48 = vmul.f32 %v93_v49, %v549_v6  ;;  %s791_s10 = sld [smem:[#allocation5 + $0x10]]  ;;  %s797_s11 = sld [smem:[#allocation5 + $0x14]] }
  0x37   :  { %v117_v51 = vmul.f32 %v115_v50, %v552_v8  ;;  %v139_v56 = vmul.f32 %v137_v59, %v557_v10  ;;  %v293_v7 = vstv %s649_s19  ;;  %v161_v9 = vmul.f32 %v159_v60, %v569_v17  ;;  %s801_s12 = sld [smem:[#allocation5 + $0x18]]  ;;  %s806_s13 = sld [smem:[#allocation5 + $0x1c]] }
  0x38   :  { %v279_v39 = vadd.f32 %v277_v52, %v256_v16  ;;  %v185_v62 = vadd.f32 %v183_v24, %v162_v41  ;;  %v227_v52 = vmul.f32 %v226_v36, %v579_v23  ;;  %v184_v3 = vmul.f32 %v182_v61, %v572_v19  ;;  %s488_s14 = smov 125   ;;  %s814_s15 = sld [smem:[#allocation5 + $0x20]] }
  0x39   :  { %v249_v15 = vmul.f32 %v248_v42, %v597_v30  ;;  %v272_v49 = vmul.f32 %v271_v44, %v620_v40  ;;  %v124_v16 = vadd.f32 %v595_v29, %v592_v28  ;;  %v294_v22 = vmul.f32 %v293_v7, %v643_v53  ;;  %s820_s16 = sld [smem:[#allocation5 + $0x24]]  ;;  %s826_s17 = sld [smem:[#allocation5 + $0x28]] }
  0x3a   :  { %v301_v57 = vadd.f32 %v299_v11, %v279_v39  ;;  %v207_v59 = vadd.f32 %v205_v35, %v185_v62  ;;  %v315_v11 = vstv %s664_s20  ;;  %v337_v60 = vstv %s672_s21  ;;  %s831_s18 = sld [smem:[#allocation5 + $0x2c]] }
  0x3b   :  { %v119_v24 = vadd.f32 %v117_v51, %v95_v48  ;;  %v103_v61 = vstv %s675_s1  ;;  %v146_v40 = vadd.f32 %v605_v33, %v124_v16  ;;  %v147_v62 = vstv %s689_s23 }
  0x3c   :  { %v323_v50 = vadd.f32 %v321_v14, %v301_v57  ;;  %v229_v41 = vadd.f32 %v227_v52, %v207_v59  ;;  %v105_v14 = vmul.f32 %v103_v61, %v549_v6  ;;  %v125_v57 = vstv %s681_s22 }
  0x3d   :  { %v141_v35 = vadd.f32 %v139_v56, %v119_v24  ;;  %v169_v28 = vstv %s691_s24  ;;  %v168_v48 = vadd.f32 %v608_v34, %v146_v40  ;;  %v149_v33 = vmul.f32 %v147_v62, %v557_v10 }
  0x3e   :  { %v345_v39 = vadd.f32 %v343_v32, %v323_v50  ;;  %v251_v29 = vadd.f32 %v249_v15, %v229_v41  ;;  %v127_v32 = vmul.f32 %v125_v57, %v552_v8  ;;  %v206_v51 = vmul.f32 %v204_v25, %v576_v21 }
  0x3f   :  { %v316_v56 = vmul.f32 %v315_v11, %v647_v55  ;;  %v163_v52 = vadd.f32 %v161_v9, %v141_v35  ;;  %v192_v50 = vstv %s701_s25  ;;  %v191_v16 = vadd.f32 %v614_v37, %v168_v48 }
  0x40   :  { %358 = vrot.lane.b32.xlu1 %v345_v39, %s486_s0  ;;  %v274_v59 = vadd.f32 %v272_v49, %v251_v29  ;;  %v129_v15 = vadd.f32 %v127_v32, %v105_v14  ;;  %v171_v34 = vmul.f32 %v169_v28, %v569_v17  ;;  %v228_v40 = vmul.f32 %v226_v36, %v584_v26 }
  0x41   :  { %v338_v24 = vmul.f32 %v337_v60, %v661_v2  ;;  %v186_v39 = vadd.f32 %v184_v3, %v163_v52  ;;  %v214_v25 = vstv %s709_s26  ;;  %v213_v41 = vadd.f32 %v617_v38, %v191_v16 }
  0x42   :  { %v296_v9 = vadd.f32 %v294_v22, %v274_v59  ;;  %v151_v49 = vadd.f32 %v149_v33, %v129_v15  ;;  %v194_v37 = vmul.f32 %v192_v50, %v572_v19  ;;  %v250_v14 = vmul.f32 %v248_v42, %v599_v31 }
  0x43   :  { %v273_v35 = vmul.f32 %v271_v44, %v632_v46  ;;  %v208_v29 = vadd.f32 %v206_v51, %v186_v39  ;;  %v236_v36 = vstv %s716_s27  ;;  %v235_v48 = vadd.f32 %v626_v43, %v213_v41 }
  0x44   :  { %v318_v3 = vadd.f32 %v316_v56, %v296_v9  ;;  %v173_v32 = vadd.f32 %v171_v34, %v151_v49  ;;  %v216_v22 = vmul.f32 %v214_v25, %v576_v21  ;;  %v295_v38 = vmul.f32 %v293_v7, %v645_v54 }
  0x45   :  { %v317_v33 = vmul.f32 %v315_v11, %v659_v63  ;;  %v230_v52 = vadd.f32 %v228_v40, %v208_v29  ;;  %v258_v42 = vstv %s721_s28  ;;  %v257_v51 = vadd.f32 %v630_v45, %v235_v48 }
  0x46   :  { %v340_v44 = vadd.f32 %v338_v24, %v318_v3  ;;  %v196_v59 = vadd.f32 %v194_v37, %v173_v32  ;;  %v238_v56 = vmul.f32 %v236_v36, %v584_v26  ;;  %v281_v16 = vstv %s732_s29 }
  0x47   :  { %v252_v43 = vadd.f32 %v250_v14, %v230_v52  ;;  %v104_v15 = vmul.f32 %v103_v61, %v535_v0  ;;  %v126_v7 = vmul.f32 %v125_v57, %v537_v1  ;;  %v280_v11 = vadd.f32 %v654_v58, %v257_v51 }
  0x48   :  { %352 = vrot.lane.b32.xlu0 %v340_v44, %s487_s5  ;;  %v218_v34 = vadd.f32 %v216_v22, %v196_v59  ;;  %v260_v40 = vmul.f32 %v258_v42, %v599_v31  ;;  %v148_v45 = vmul.f32 %v147_v62, %v543_v4  ;;  %v303_v39 = vstv %s741_s30 }
  0x49   :  { %v275_v24 = vadd.f32 %v273_v35, %v252_v43  ;;  %v128_v9 = vadd.f32 %v126_v7, %v104_v15  ;;  %v170_v41 = vmul.f32 %v169_v28, %v545_v5  ;;  %v339_v61 = vmul.f32 %v337_v60, %v677_v18 }
  0x4a   :  { %v302_v57 = vadd.f32 %v669_v12, %v280_v11  ;;  %v240_v49 = vadd.f32 %v238_v56, %v218_v34  ;;  %v283_v58 = vmul.f32 %v281_v16, %v632_v46  ;;  %v325_v14 = vstv %s748_s3 }
  0x4b   :  { %v297_v37 = vadd.f32 %v295_v38, %v275_v24  ;;  %v150_v29 = vadd.f32 %v148_v45, %v128_v9  ;;  %v193_v62 = vmul.f32 %v192_v50, %v561_v13  ;;  %v305_v3 = vmul.f32 %v303_v39, %v645_v54 }
  0x4c   :  { %v324_v35 = vadd.f32 %v684_v27, %v302_v57  ;;  %v262_v28 = vadd.f32 %v260_v40, %v240_v49  ;;  %v347_v32 = vstv %s755_s4  ;;  %v215_v12 = vmul.f32 %v214_v25, %v574_v20 }
  0x4d   :  { %v319_v48 = vadd.f32 %v317_v33, %v297_v37  ;;  %v172_v60 = vadd.f32 %v170_v41, %v150_v29  ;;  %v327_v38 = vmul.f32 %v325_v14, %v659_v63  ;;  %v237_v44 = vmul.f32 %v236_v36, %v579_v23  ;;  %v865_v36 = vld [vmem:[#allocation8_spill] sm:$0xff] }
  0x4e   :  { %v346_v22 = vadd.f32 %v696_v47, %v324_v35  ;;  %v285_v50 = vadd.f32 %v283_v58, %v262_v28  ;;  %v349_v33 = vmul.f32 %v347_v32, %v677_v18  ;;  %v259_v51 = vmul.f32 %v258_v42, %v597_v30 }
  0x4f   :  { %v341_v52 = vadd.f32 %v339_v61, %v319_v48  ;;  %v195_v27 = vadd.f32 %v193_v62, %v172_v60  ;;  %v110_v59 = vstv %s769_s6  ;;  %v282_v15 = vmul.f32 %v281_v16, %v865_v36 }
  0x50   :  { %360 = vrot.lane.b32.xlu1 %v346_v22, %s486_s0  ;;  %v307_v25 = vadd.f32 %v305_v3, %v285_v50  ;;  %v132_v7 = vstv %s778_s7  ;;  %v111_v34 = vmul.f32 %v110_v59, %v537_v1  ;;  %v304_v45 = vmul.f32 %v303_v39, %v643_v53 }
  0x51   :  { %354 = vrot.lane.b32.xlu0 %v341_v52, %s487_s5  ;;  %v217_v47 = vadd.f32 %v215_v12, %v195_v27  ;;  %v154_v42 = vstv %s784_s8  ;;  %v88_v24 = vstv %s786_s9  ;;  %v133_v16 = vmul.f32 %v132_v7, %v543_v4 }
  0x52   :  { %v329_v56 = vadd.f32 %v327_v38, %v307_v25  ;;  %v89_v9 = vmul.f32 %v88_v24, %v535_v0  ;;  %v326_v61 = vmul.f32 %v325_v14, %v647_v55  ;;  %v177_v1 = vstv %s791_s10 }
  0x53   :  { %v239_v43 = vadd.f32 %v237_v44, %v217_v47  ;;  %v112_v39 = vmul.f32 %v110_v59, %v552_v8  ;;  %v348_v57 = vmul.f32 %v347_v32, %v661_v2  ;;  %v155_v49 = vmul.f32 %v154_v42, %v545_v5 }
  0x54   :  { %v351_v11 = vadd.f32 %v349_v33, %v329_v56  ;;  %v113_v58 = vadd.f32 %v111_v34, %v89_v9  ;;  %v199_v4 = vstv %s797_s11  ;;  %v134_v0 = vmul.f32 %v132_v7, %v557_v10 }
  0x55   :  { %v261_v40 = vadd.f32 %v259_v51, %v239_v43  ;;  %v90_v14 = vmul.f32 %v88_v24, %v549_v6  ;;  %v178_v29 = vmul.f32 %v177_v1, %v561_v13  ;;  %v221_v8 = vstv %s801_s12 }
  0x56   :  { %366 = vrot.lane.b32.xlu1 %v351_v11, %s488_s14  ;;  %v135_v62 = vadd.f32 %v133_v16, %v113_v58  ;;  %v156_v5 = vmul.f32 %v154_v42, %v569_v17  ;;  %v200_v3 = vmul.f32 %v199_v4, %v574_v20  ;;  %v243_v10 = vstv %s806_s13 }
  0x57   :  { %v284_v41 = vadd.f32 %v282_v15, %v261_v40  ;;  %v114_v28 = vadd.f32 %v112_v39, %v90_v14  ;;  %v179_v6 = vmul.f32 %v177_v1, %v572_v19  ;;  %v222_v60 = vmul.f32 %v221_v8, %v579_v23 }
  0x58   :  { %v157_v48 = vadd.f32 %v155_v49, %v135_v62  ;;  %v266_v17 = vstv %s814_s15  ;;  %v201_v22 = vmul.f32 %v199_v4, %v576_v21  ;;  %v244_v20 = vmul.f32 %v243_v10, %v597_v30 }
  0x59   :  { %v306_v37 = vadd.f32 %v304_v45, %v284_v41  ;;  %v136_v13 = vadd.f32 %v134_v0, %v114_v28  ;;  %v288_v52 = vstv %s820_s16  ;;  %v223_v27 = vmul.f32 %v221_v8, %v584_v26 }
  0x5a   :  { %v180_v12 = vadd.f32 %v178_v29, %v157_v48  ;;  %v267_v19 = vmul.f32 %v266_v17, %v865_v36  ;;  %v310_v33 = vstv %s826_s17  ;;  %v245_v23 = vmul.f32 %v243_v10, %v599_v31 }
  0x5b   :  { %v328_v35 = vadd.f32 %v326_v61, %v306_v37  ;;  %v158_v50 = vadd.f32 %v156_v5, %v136_v13  ;;  %v289_v51 = vmul.f32 %v288_v52, %v643_v53  ;;  %v332_v56 = vstv %s831_s18 }
  0x5c   :  { %v202_v38 = vadd.f32 %v200_v3, %v180_v12  ;;  %v268_v21 = vmul.f32 %v266_v17, %v632_v46  ;;  %v311_v30 = vmul.f32 %v310_v33, %v647_v55  ;;  %v290_v26 = vmul.f32 %v288_v52, %v645_v54 }
  0x5d   :  { %v350_v32 = vadd.f32 %v348_v57, %v328_v35  ;;  %v181_v44 = vadd.f32 %v179_v6, %v158_v50  ;;  %v333_v36 = vmul.f32 %v332_v56, %v661_v2  ;;  %v312_v34 = vmul.f32 %v310_v33, %v659_v63 }
  0x5e   :  { %v224_v25 = vadd.f32 %v222_v60, %v202_v38  ;;  %v334_v53 = vmul.f32 %v332_v56, %v677_v18 }
  0x5f   :  { %364 = vrot.lane.b32.xlu0 %v350_v32, %s488_s14  ;;  %v203_v47 = vadd.f32 %v201_v22, %v181_v44 }
  0x60   :  { %v246_v59 = vadd.f32 %v244_v20, %v224_v25 }
  0x61   :  { %v225_v43 = vadd.f32 %v223_v27, %v203_v47 }
  0x62   :  { %v269_v15 = vadd.f32 %v267_v19, %v246_v59 }
  0x63   :  { %v247_v7 = vadd.f32 %v245_v23, %v225_v43 }
  0x64   :  { %v291_v11 = vadd.f32 %v289_v51, %v269_v15 }
  0x65   :  { %v270_v31 = vadd.f32 %v268_v21, %v247_v7 }
  0x66   :  { %v313_v40 = vadd.f32 %v311_v30, %v291_v11 }
  0x67   :  { %v292_v45 = vadd.f32 %v290_v26, %v270_v31 }
  0x68   :  { %v335_v42 = vadd.f32 %v333_v36, %v313_v40 }
  0x69   :  { %v314_v24 = vadd.f32 %v312_v34, %v292_v45 }
  0x6b   :  { %v336_v46 = vadd.f32 %v334_v53, %v314_v24 }
  0xb2   :  { %v359_v16 = vpop.permute.xlu1 %358 }
  0xba   :  { %v353_v9 = vpop.permute.xlu0 %352 }
  0xbb   :  { %v356_v57 = vadd.f32 %v353_v9, %v335_v42 }
  0xbd   :  { %v362_v63 = vadd.f32 %v359_v16, %v356_v57 }
  0xc2   :  { %v361_v55 = vpop.permute.xlu1 %360 }
  0xc3   :  { %v355_v41 = vpop.permute.xlu0 %354 }
  0xc4   :  { %v357_v61 = vadd.f32 %v355_v41, %v336_v46 }
  0xc6   :  { %v363_v54 = vadd.f32 %v361_v55, %v357_v61 }
  0xc8   :  { %v367_v1 = vpop.permute.xlu1 %366 }
  0xc9   :  { %v369_v39 = vadd.f32 %v367_v1, %v363_v54 }
  0xcb   :  { %v371_v2 = vmul.f32 0.5, %v369_v39 }
  0xcd   :  { %440 = vtanh.f32 %v371_v2 }
  0xd1   :  { %v365_v49 = vpop.permute.xlu0 %364 }
  0xd2   :  { %v368_v58 = vadd.f32 %v365_v49, %v362_v63 }
  0xd4   :  { %v370_v37 = vmul.f32 0.5, %v368_v58 }
  0xd6   :  { %442 = vtanh.f32 %v370_v37 }
  0xd7   :  { %v441_v18 = vpop.eup %440 }
  0xd8   :  { %v375_v4 = vadd.f32 1.0, %v441_v18 }
  0xda   :  { %v377_v0 = vmul.f32 0.5, %v375_v4 }
  0xdc   :  { %379 = vst [vmem:[%s861_s2 + $0x8] sm:$0x1f] %v377_v0 }
  0xe0   :  { %v443_v14 = vpop.eup %442 }
  0xe1   :  { %v374_v29 = vadd.f32 1.0, %v443_v14 }
  0xe3   :  { %v376_v62 = vmul.f32 0.5, %v374_v29 }
  0xe5   :  { %378 = vst [vmem:[%s861_s2] sm:$0xff] %v376_v62 }
  0xe6   :  { %384 = vsyncpa [#allocation3], 1 }
  0xe7   :  { %385 = vsyncpa [#allocation4], 1 }

</bundles_post_ra>
